<compile_context>
chip_gen: v6e
topology: v6e:2x2x1
jax: 0.10.0
libtpu: 0.0.40
codegen_flags: <defaults>
</compile_context>

<pallas_src>
import jax
import jax.numpy as jnp
from jax.experimental import pallas as pl
from jax.experimental.pallas import tpu as pltpu


def _round_up(n, m):
    return ((n + m - 1) // m) * m


_MAX_TB = 8              # cap on batch elements per grid step (static unroll bound)
_SMALL_BYTES = 256 << 10  # single-step cutoff; above this use the pipelined grid


def _dap_kernel(w_ref, x_ref, o_ref):
    # w_ref: (C, C)        -- full weight, resident every grid step
    # x_ref: (TB, C, THW)  -- TB <= _MAX_TB batch elements per step
    # o_ref: (TB, C, THW)
    w = w_ref[...]
    for b in range(x_ref.shape[0]):  # static unroll; TB is capped at 8
        o_ref[b] = jnp.dot(
            w, x_ref[b], preferred_element_type=jnp.float32
        ).astype(o_ref.dtype)


def _budget_for_device():
    """(tile_budget_bytes, vmem_limit_bytes) tuned per TPU generation."""
    try:
        kind = jax.devices()[0].device_kind.lower()
    except Exception:
        kind = ""
    if "v7" in kind:
        # 64 MiB physical VMEM: 4 MiB tile -> ~16 MiB double-buffered in+out,
        # comfortably under the 32 MiB scoped limit.
        return 4 << 20, 32 << 20
    if "v5" in kind or "v6" in kind:
        # 128 MiB physical VMEM: 8 MiB tile -> ~32 MiB double-buffered in+out.
        return 8 << 20, 64 << 20
    # Unknown part: conservative numbers that are safe everywhere.
    return 4 << 20, 32 << 20


def dap_forward(x, weight, *, force_tiled=False):
    """DAP forward (cfg.DAP_BY_TEMPERATURE == False path).

    x:      (bs, 1, du, dv, h, w)
    weight: (dimC, dimC) -- the SQUEEZED (out_c, in_c) matrix from the
            Conv2d(dimC, dimC, 1, bias=False) weight of shape (C, C, 1, 1).
    returns (bs, 1, du, dv, h, w)
    """
    bs, one, du, dv, h, w = x.shape
    assert one == 1
    C = du * dv
    HW = h * w
    assert weight.shape == (C, C), "pass the squeezed (out_c, in_c) 1x1-conv weight"

    # glue reshapes in plain JAX (squeeze + view)
    x_flat = x.reshape(bs, C, HW)

    dtype_bytes = jnp.dtype(x.dtype).itemsize
    cpad = _round_up(C, 8)  # fp32 sublane padding of the channel axis
    tile_budget, vmem_limit = _budget_for_device()

    # Lane-dense spatial tile cap (multiple of 128) for a single batch element.
    thw_cap = max(512, ((tile_budget // (cpad * dtype_bytes)) // 128) * 128)

    whole_bytes = bs * cpad * HW * dtype_bytes
    small = (not force_tiled) and (bs <= _MAX_TB) and (whole_bytes <= _SMALL_BYTES)

    if small:
        # Tiny slab (<= 256 KiB): a single fat grid step; pipelining could not
        # amortize anything at this size.
        grid = (1,)
        in_specs = [
            pl.BlockSpec((C, C), lambda i: (0, 0)),
            pl.BlockSpec((bs, C, HW), lambda i: (0, 0, 0)),
        ]
        out_specs = pl.BlockSpec((bs, C, HW), lambda i: (0, 0, 0))
        dim_sem = ("arbitrary",)
    else:
        if HW > thw_cap:
            # Large spatial extent: lane-dense spatial tiles, one batch/step.
            thw, tb = thw_cap, 1
        else:
            # Small/medium spatial extent: pack several batch elements per
            # step so each step still moves ~tile_budget bytes of HBM.
            thw = HW  # full last dim is always a legal block extent
            tb = max(1, tile_budget // (cpad * HW * dtype_bytes))
            tb = min(tb, bs, _MAX_TB)
        grid = (pl.cdiv(bs, tb), pl.cdiv(HW, thw))
        in_specs = [
            pl.BlockSpec((C, C), lambda b, p: (0, 0)),
            pl.BlockSpec((tb, C, thw), lambda b, p: (b, 0, p)),
        ]
        out_specs = pl.BlockSpec((tb, C, thw), lambda b, p: (b, 0, p))
        # Both axes parallel: lets v7x's 2 TensorCores shard the grid;
        # measured no-op on single-TC v5e/v6e.
        dim_sem = ("parallel", "parallel")

    # Advisory cost estimate: tells XLA this custom call is HBM-bound so it can
    # schedule neighboring ops around it.
    cost = pl.CostEstimate(
        flops=2 * C * C * HW * bs,
        transcendentals=0,
        bytes_accessed=(2 * C * HW * bs + C * C) * dtype_bytes,
    )

    out_flat = pl.pallas_call(
        _dap_kernel,
        out_shape=jax.ShapeDtypeStruct((bs, C, HW), x.dtype),
        grid_spec=pltpu.PrefetchScalarGridSpec(
            num_scalar_prefetch=0,
            grid=grid,
            in_specs=in_specs,
            out_specs=out_specs,
        ),
        compiler_params=pltpu.CompilerParams(
            dimension_semantics=dim_sem,
            vmem_limit_bytes=vmem_limit,
        ),
        cost_estimate=cost,
    )(weight, x_flat)

    # glue reshapes in plain JAX (view back + unsqueeze)
    return out_flat.reshape(bs, du, dv, h, w)[:, None]


def dap_reference(x, weight):
    bs, one, du, dv, h, w = x.shape
    C = du * dv
    x_flat = x.reshape(bs, C, h * w)
    out = jnp.einsum("oc,bcp->bop", weight, x_flat)
    return out.reshape(bs, du, dv, h, w)[:, None]


if __name__ == "__main__":
    # Small shapes consistent with the module: md=1 -> dimC = (2*1+1)^2 = 9
    md = 1
    du = dv = 2 * md + 1
    dimC = du * dv
    bs, h, w = 2, 16, 16

    key = jax.random.PRNGKey(0)
    kx, kw = jax.random.split(key)
    x = jax.random.normal(kx, (bs, 1, du, dv, h, w), dtype=jnp.float32)

    # Deterministic synthetic init of the 1x1 conv weight (Conv2d(dimC, dimC, 1),
    # bias=False) — kaiming-uniform-like bound; already squeezed to (C, C).
    bound = 1.0 / jnp.sqrt(jnp.float32(dimC))
    weight = jax.random.uniform(kw, (dimC, dimC), dtype=jnp.float32,
                                minval=-bound, maxval=bound)

    ref = dap_reference(x, weight)

    # Small-problem (single grid step) path.
    out_small = jax.block_until_ready(dap_forward(x, weight))
    assert out_small.shape == (bs, 1, du, dv, h, w)
    assert jnp.allclose(out_small, ref, atol=1e-5, rtol=1e-5), "small-path mismatch"

    # Tiled, batch-blocked path (grid over batch blocks x spatial tiles),
    # exercised at the same shapes via force_tiled.
    out_tiled = jax.block_until_ready(dap_forward(x, weight, force_tiled=True))
    assert jnp.allclose(out_tiled, ref, atol=1e-5, rtol=1e-5), "tiled-path mismatch"

    print("KERNEL_OK")
</pallas_src>

<mosaic_0001>
module attributes {stable_mosaic.version = 11 : i64} {
  func.func @_dap_kernel(%arg0: i32, %arg1: memref<9x9xf32, #tpu.memory_space<vmem>>, %arg2: memref<2x9x256xf32, #tpu.memory_space<vmem>>, %arg3: memref<2x9x256xf32, #tpu.memory_space<vmem>>) attributes {dimension_semantics = [#tpu.dimension_semantics<arbitrary>], iteration_bounds = array<i64: 1>, scalar_prefetch = 0 : i64, scratch_operands = 0 : i64, tpu.core_type = #tpu.core_type<tc>, window_params = [{pipeline_mode = #tpu.pipeline_mode<synchronous>, transform_indices = @transform_0, window_bounds = array<i64: 9, 9>}, {pipeline_mode = #tpu.pipeline_mode<synchronous>, transform_indices = @transform_1, window_bounds = array<i64: 2, 9, 256>}, {pipeline_mode = #tpu.pipeline_mode<synchronous>, transform_indices = @transform_2, window_bounds = array<i64: 2, 9, 256>}]} {
    %c0 = arith.constant 0 : index
    %c0_0 = arith.constant 0 : index
    %0 = vector.load %arg1[%c0, %c0_0] : memref<9x9xf32, #tpu.memory_space<vmem>>, vector<9x9xf32>
    %c0_1 = arith.constant 0 : index
    %c0_2 = arith.constant 0 : index
    %c0_3 = arith.constant 0 : index
    %1 = vector.load %arg2[%c0_1, %c0_2, %c0_3] : memref<2x9x256xf32, #tpu.memory_space<vmem>>, vector<1x9x256xf32>
    %2 = vector.shape_cast %1 : vector<1x9x256xf32> to vector<9x256xf32>
    %cst = arith.constant dense<0.000000e+00> : vector<9x256xf32>
    %3 = tpu.matmul %0, %2, %cst {dimension_numbers = #tpu.dot_dimension_numbers<[1], [0], [0], [1], [0, 0, 1, 1], [], []>} : vector<9x9xf32>, vector<9x256xf32>, vector<9x256xf32> -> vector<9x256xf32>
    %c0_4 = arith.constant 0 : index
    %c0_5 = arith.constant 0 : index
    %c0_6 = arith.constant 0 : index
    %4 = vector.load %arg3[%c0_4, %c0_5, %c0_6] : memref<2x9x256xf32, #tpu.memory_space<vmem>>, vector<1x9x256xf32>
    %5 = vector.shape_cast %4 : vector<1x9x256xf32> to vector<9x256xf32>
    %6 = vector.shape_cast %3 : vector<9x256xf32> to vector<1x9x256xf32>
    tpu.vector_store %arg3[%c0_4, %c0_5, %c0_6], %6 {strides = array<i32>} : memref<2x9x256xf32, #tpu.memory_space<vmem>>, vector<1x9x256xf32>,
    %c1 = arith.constant 1 : index
    %c0_7 = arith.constant 0 : index
    %c0_8 = arith.constant 0 : index
    %7 = vector.load %arg2[%c1, %c0_7, %c0_8] : memref<2x9x256xf32, #tpu.memory_space<vmem>>, vector<1x9x256xf32>
    %8 = vector.shape_cast %7 : vector<1x9x256xf32> to vector<9x256xf32>
    %cst_9 = arith.constant dense<0.000000e+00> : vector<9x256xf32>
    %9 = tpu.matmul %0, %8, %cst_9 {dimension_numbers = #tpu.dot_dimension_numbers<[1], [0], [0], [1], [0, 0, 1, 1], [], []>} : vector<9x9xf32>, vector<9x256xf32>, vector<9x256xf32> -> vector<9x256xf32>
    %c1_10 = arith.constant 1 : index
    %c0_11 = arith.constant 0 : index
    %c0_12 = arith.constant 0 : index
    %10 = vector.load %arg3[%c1_10, %c0_11, %c0_12] : memref<2x9x256xf32, #tpu.memory_space<vmem>>, vector<1x9x256xf32>
    %11 = vector.shape_cast %10 : vector<1x9x256xf32> to vector<9x256xf32>
    %12 = vector.shape_cast %9 : vector<9x256xf32> to vector<1x9x256xf32>
    tpu.vector_store %arg3[%c1_10, %c0_11, %c0_12], %12 {strides = array<i32>} : memref<2x9x256xf32, #tpu.memory_space<vmem>>, vector<1x9x256xf32>,
    return
  }
  func.func @transform_0(%arg0: i32) -> (i32, i32) {
    %c0_i32 = arith.constant 0 : i32
    %c0_i32_0 = arith.constant 0 : i32
    %c0_i32_1 = arith.constant 0 : i32
    return %c0_i32, %c0_i32_0 : i32, i32
  }
  func.func @transform_1(%arg0: i32) -> (i32, i32, i32) {
    %c0_i32 = arith.constant 0 : i32
    %c0_i32_0 = arith.constant 0 : i32
    %c0_i32_1 = arith.constant 0 : i32
    %c0_i32_2 = arith.constant 0 : i32
    return %c0_i32, %c0_i32_0, %c0_i32_1 : i32, i32, i32
  }
  func.func @transform_2(%arg0: i32) -> (i32, i32, i32) {
    %c0_i32 = arith.constant 0 : i32
    %c0_i32_0 = arith.constant 0 : i32
    %c0_i32_1 = arith.constant 0 : i32
    %c0_i32_2 = arith.constant 0 : i32
    return %c0_i32, %c0_i32_0, %c0_i32_1 : i32, i32, i32
  }
}

</mosaic_0001>

<bundles_post_ra>
// kernel: tpu_custom_call.1
= control target key start
LH: loop header
LB: loop body
LE: loop exit
PB: predicated region body
PF: predicated region fallthrough
CT: control target
= control target key end

     0   :  { %vm24_vm0 = vcmask 1040384   ;;  %v226_v3 = vmov 0.0   ;;  %vm17_vm1 = vcmask 72704   ;;  %s296_s1 = inlined_call_operand.vmem [shape: f32[2,9,256], index: 1, kind: input, shape index: {}]   ;;  %s297_s0 = inlined_call_operand.vmem [shape: f32[9,9], index: 0, kind: input, shape index: {}]   ;;  %s298_s2 = inlined_call_operand.vmem [shape: f32[2,9,256], index: 2, kind: output, shape index: {}]  }
   0x1   :  { %v16_v0 = vld [vmem:[%s296_s1 + $0x18] sm:$0x1]  ;;  %v15_v2 = vld [vmem:[%s296_s1 + $0x10] sm:$0x1]  ;;  %95 = vmatprep.mubr.f32.mxu0 %v226_v3  ;;  %187 = vmatprep.mubr.f32.mxu1 %v226_v3  ;;  %v14_v5 = vld [vmem:[%s296_s1 + $0x8] sm:$0xff] }
   0x2   :  { %v216_v1 = vld [vmem:[%s296_s1 + $0x38] sm:$0x1]  ;;  %209 = vmatprep.subr.msk.mxu0 %vm24_vm0, %v16_v0  ;;  %v215_v4 = vld [vmem:[%s296_s1 + $0x30] sm:$0x1]  ;;  %v214_v6 = vld [vmem:[%s296_s1 + $0x28] sm:$0xff] }
   0x3   :  { %217 = vmatprep.subr.msk.mxu1 %vm24_vm0, %v216_v1  ;;  %210 = vmatpush1.msk.msra.mxu0 %vm24_vm0, %v15_v2  ;;  %v13_v7 = vld [vmem:[%s296_s1] sm:$0xff]  ;;  %v12_v10 = vld [vmem:[%s297_s0 + $0x8] sm:$0x1] }
   0x4   :  { %218 = vmatpush1.msk.msra.mxu1 %vm24_vm0, %v215_v4  ;;  %v213_v8 = vld [vmem:[%s296_s1 + $0x20] sm:$0xff]  ;;  %61 = vmatprep.subr.mxu0 %v14_v5 }
   0x5   :  { %v11_v9 = vld [vmem:[%s297_s0] sm:$0xff]  ;;  %153 = vmatprep.subr.mxu1 %v214_v6  ;;  %62 = vmatpush1.msra.mxu0 %v13_v7 }
   0x6   :  { %154 = vmatpush1.msra.mxu1 %v213_v8  ;;  %211 = vmatmul.mubr.msk.f32.vlgmr.msra.gmra.mxu0 %vm17_vm1, %v11_v9 }
   0x7   :  { %219 = vmatmul.mubr.msk.f32.vlgmr.msra.gmra.mxu1 %vm17_vm1, %v11_v9  ;;  %101 = vmatprep.mubr.f32.mxu0 %v226_v3 }
   0x8   :  { %193 = vmatprep.mubr.f32.mxu1 %v226_v3 }
   0xa   :  { %212 = vmatmul.mubr.msk.f32.gmra.mxu0 %vm17_vm1, %v12_v10 }
   0xb   :  { %220 = vmatmul.mubr.msk.f32.gmra.mxu1 %vm17_vm1, %v12_v10 }
  0xc6   :  { %v97_v11 = vpop.f32.mrf.mxu0 }
  0xc7   :  { %v189_v12 = vpop.f32.mrf.mxu1  ;;  %108 = vst [vmem:[%s298_s2] sm:$0xff] %v97_v11 }
  0xc8   :  { %221 = vst [vmem:[%s298_s2 + $0x20] sm:$0xff] %v189_v12  ;;  %v99_v13 = vpop.f32.mrf.mxu0 }
  0xc9   :  { %v191_v14 = vpop.f32.mrf.mxu1  ;;  %109 = vst [vmem:[%s298_s2 + $0x8] sm:$0xff] %v99_v13 }
  0xca   :  { %222 = vst [vmem:[%s298_s2 + $0x28] sm:$0xff] %v191_v14  ;;  %v103_v15 = vpop.f32.mrf.mxu0 }
  0xcb   :  { %v195_v16 = vpop.f32.mrf.mxu1  ;;  %110 = vst [vmem:[%s298_s2 + $0x10] sm:$0x1] %v103_v15 }
  0xcc   :  { %223 = vst [vmem:[%s298_s2 + $0x30] sm:$0x1] %v195_v16  ;;  %v105_v17 = vpop.f32.mrf.mxu0 }
  0xcd   :  { %v197_v18 = vpop.f32.mrf.mxu1  ;;  %111 = vst [vmem:[%s298_s2 + $0x18] sm:$0x1] %v105_v17 }
  0xce   :  { %224 = vst [vmem:[%s298_s2 + $0x38] sm:$0x1] %v197_v18 }

</bundles_post_ra>
